<compile_context>
chip_gen: v7x
topology: tpu7x:2x2x1
jax: 0.10.0
libtpu: 0.0.40
codegen_flags: <defaults>
</compile_context>

<pallas_src>
import jax
import jax.numpy as jnp
from jax.experimental import pallas as pl
from jax.experimental.pallas import tpu as pltpu

D_IN, D_H1, D_H2, D_OUT = 100, 50, 40, 40
D_IN_PAD = 128                 # lane-aligned K dim (col 100 carries the bias "1")
D_CAT = D_H2 + D_OUT           # 80: out2 || out3 stored as one lane-dense slab


def fused_affine_kernel(x_ref, w_ref, y_ref):
    # Entire (activation-free) 3-layer chain, bias included, in ONE MXU pass.
    y_ref[...] = jnp.dot(
        x_ref[...], w_ref[...], preferred_element_type=jnp.float32
    ).astype(y_ref.dtype)


def _round_up(n, m):
    return ((n + m - 1) // m) * m


def toy_model_forward(x, params, *, tile_b=512):
    """x: [B, 100] float32. params: transposed weights [in, out], biases [1, out]."""
    B = x.shape[0]
    w1, b1 = params["w1"], params["b1"]
    w2, b2 = params["w2"], params["b2"]
    w3, b3 = params["w3"], params["b3"]

    # ---- Fold the affine chain (exact: the module has no activations). ----
    w12 = w1 @ w2                                   # [100, 40]
    b12 = b1 @ w2 + b2                              # [1, 40]
    w123 = w12 @ w3                                 # [100, 40]
    b123 = b12 @ w3 + b3                            # [1, 40]
    w_cat = jnp.concatenate([w12, w123], axis=1)    # [100, 80]
    b_cat = jnp.concatenate([b12, b123], axis=1)    # [1, 80]

    # ---- Augmented weight: rows 0..99 = fused W, row 100 = fused bias. ----
    w_aug = (
        jnp.zeros((D_IN_PAD, D_CAT), jnp.float32)
        .at[:D_IN, :].set(w_cat)
        .at[D_IN, :].set(b_cat[0])
    )

    # ---- Adaptive batch tile: large (<= tile_b), multiple of 8; pad B up. ----
    tile_b = max(8, min(tile_b, _round_up(B, 8)))
    Bp = _round_up(B, tile_b)

    # ---- Pad K (100 -> 128); column 100 = 1.0 activates the bias row. ----
    x_pad = (
        jnp.zeros((Bp, D_IN_PAD), jnp.float32)
        .at[:B, :D_IN].set(x)
        .at[:B, D_IN].set(1.0)
    )

    grid = (Bp // tile_b,)

    flops = 2 * B * (D_IN * D_H1 + D_H1 * D_H2 + D_H2 * D_OUT)
    bytes_accessed = 4 * (Bp * D_IN_PAD + Bp * D_CAT + D_IN_PAD * D_CAT)

    y = pl.pallas_call(
        fused_affine_kernel,
        out_shape=jax.ShapeDtypeStruct((Bp, D_CAT), jnp.float32),
        grid_spec=pltpu.PrefetchScalarGridSpec(
            num_scalar_prefetch=0,
            grid=grid,
            in_specs=[
                pl.BlockSpec((tile_b, D_IN_PAD), lambda i: (i, 0)),  # streamed x tile
                pl.BlockSpec((D_IN_PAD, D_CAT), lambda i: (0, 0)),   # resident fused W+b
            ],
            out_specs=pl.BlockSpec((tile_b, D_CAT), lambda i: (i, 0)),
        ),
        compiler_params=pltpu.CompilerParams(
            dimension_semantics=("parallel",),  # batch axis shards across TCs on v7x
        ),
        cost_estimate=pl.CostEstimate(
            flops=flops, transcendentals=0, bytes_accessed=bytes_accessed),
    )(x_pad, w_aug)

    y = y[:B]
    out2 = y[:, :D_H2]
    out3 = y[:, D_H2:]
    return out2, out3


def init_params(key):
    """Deterministic init matching nn.Linear shapes (weights stored transposed [in, out])."""
    ks = jax.random.split(key, 6)

    def linear(kw, kb, fan_in, fan_out):
        bound = 1.0 / jnp.sqrt(fan_in)
        w = jax.random.uniform(kw, (fan_in, fan_out), jnp.float32, -bound, bound)
        b = jax.random.uniform(kb, (1, fan_out), jnp.float32, -bound, bound)
        return w, b

    w1, b1 = linear(ks[0], ks[1], D_IN, D_H1)
    w2, b2 = linear(ks[2], ks[3], D_H1, D_H2)
    w3, b3 = linear(ks[4], ks[5], D_H2, D_OUT)
    return {"w1": w1, "b1": b1, "w2": w2, "b2": b2, "w3": w3, "b3": b3}


if __name__ == "__main__":
    key = jax.random.PRNGKey(0)
    k_x, k_p = jax.random.split(key)

    B = 8
    x = jax.random.normal(k_x, (B, D_IN), jnp.float32)
    params = init_params(k_p)

    out2, out3 = toy_model_forward(x, params)
    jax.block_until_ready((out2, out3))

    # Sanity check against the layered pure-JAX reference (matches PyTorch ToyModel).
    ref1 = x @ params["w1"] + params["b1"]
    ref2 = ref1 @ params["w2"] + params["b2"]
    ref3 = ref2 @ params["w3"] + params["b3"]
    assert out2.shape == (B, D_H2) and out3.shape == (B, D_OUT)
    # Slightly looser tolerance: the collapsed-affine form changes accumulation order.
    assert jnp.allclose(out2, ref2, atol=1e-4, rtol=1e-4)
    assert jnp.allclose(out3, ref3, atol=1e-4, rtol=1e-4)

    print("KERNEL_OK")
</pallas_src>

<mosaic_0001>
module attributes {stable_mosaic.version = 11 : i64} {
  func.func @fused_affine_kernel(%arg0: i32, %arg1: memref<8x128xf32, #tpu.memory_space<vmem>>, %arg2: memref<128x80xf32, #tpu.memory_space<vmem>>, %arg3: memref<8x80xf32, #tpu.memory_space<vmem>>) attributes {dimension_semantics = [#tpu.dimension_semantics<parallel>], iteration_bounds = array<i64: 1>, scalar_prefetch = 0 : i64, scratch_operands = 0 : i64, tpu.core_type = #tpu.core_type<tc>, window_params = [{transform_indices = @transform_0, window_bounds = array<i64: 8, 128>}, {pipeline_mode = #tpu.pipeline_mode<synchronous>, transform_indices = @transform_1, window_bounds = array<i64: 128, 80>}, {transform_indices = @transform_2, window_bounds = array<i64: 8, 80>}]} {
    %c0 = arith.constant 0 : index
    %c0_0 = arith.constant 0 : index
    %0 = vector.load %arg1[%c0, %c0_0] : memref<8x128xf32, #tpu.memory_space<vmem>>, vector<8x128xf32>
    %c0_1 = arith.constant 0 : index
    %c0_2 = arith.constant 0 : index
    %1 = vector.load %arg2[%c0_1, %c0_2] : memref<128x80xf32, #tpu.memory_space<vmem>>, vector<128x80xf32>
    %cst = arith.constant dense<0.000000e+00> : vector<8x80xf32>
    %2 = tpu.matmul %0, %1, %cst {dimension_numbers = #tpu.dot_dimension_numbers<[1], [0], [0], [1], [0, 0, 1, 1], [], []>} : vector<8x128xf32>, vector<128x80xf32>, vector<8x80xf32> -> vector<8x80xf32>
    %c0_3 = arith.constant 0 : index
    %c0_4 = arith.constant 0 : index
    %3 = vector.load %arg3[%c0_3, %c0_4] : memref<8x80xf32, #tpu.memory_space<vmem>>, vector<8x80xf32>
    tpu.vector_store %arg3[%c0_3, %c0_4], %2 {strides = array<i32>} : memref<8x80xf32, #tpu.memory_space<vmem>>, vector<8x80xf32>,
    return
  }
  func.func @transform_0(%arg0: i32) -> (i32, i32) {
    %c0_i32 = arith.constant 0 : i32
    %c0_i32_0 = arith.constant 0 : i32
    return %arg0, %c0_i32 : i32, i32
  }
  func.func @transform_1(%arg0: i32) -> (i32, i32) {
    %c0_i32 = arith.constant 0 : i32
    %c0_i32_0 = arith.constant 0 : i32
    %c0_i32_1 = arith.constant 0 : i32
    return %c0_i32, %c0_i32_0 : i32, i32
  }
  func.func @transform_2(%arg0: i32) -> (i32, i32) {
    %c0_i32 = arith.constant 0 : i32
    %c0_i32_0 = arith.constant 0 : i32
    return %arg0, %c0_i32 : i32, i32
  }
}

</mosaic_0001>

<bundles_post_ra>
// kernel: tpu_custom_call.1
= control target key start
LH: loop header
LB: loop body
LE: loop exit
PB: predicated region body
PF: predicated region fallthrough
CT: control target
= control target key end

     0   :  { %v219_v3 = vmov 0.0|0.0   ;;  %vm220_vm0 = vmmov 0   ;;  %v221_v6 = vmov 0.0   ;;  %s301_s0 = inlined_call_operand.vmem [shape: f32[8,128], index: 0, kind: input, shape index: {}]   ;;  %s302_s1 = inlined_call_operand.vmem [shape: f32[128,80], index: 1, kind: input, shape index: {}]   ;;  %s303_s2 = inlined_call_operand.hbm [shape: f32[8,80], index: 2, kind: output, shape index: {}]  }
   0x1   :  { %v13_v0 = vld [vmem:[%s302_s1] sm:$0xff]  ;;  %v14_v1 = vld [vmem:[%s302_s1 + $0x8] sm:$0xff]  ;;  %v15_v2 = vld [vmem:[%s302_s1 + $0x10] sm:$0xff]  ;;  %167 = vmatprep.subr.bf16.mxu0 %v219_v3  ;;  %164 = vmatprep.mubr.msk.f32.mxu0 %vm220_vm0, %v221_v6 }
   0x2   :  { %v168_v4 = vpack.c.bf16 %v14_v1, %v13_v0  ;;  %v16_v5 = vld [vmem:[%s302_s1 + $0x18] sm:$0xff]  ;;  %v17_v8 = vld [vmem:[%s302_s1 + $0x20] sm:$0xff]  ;;  %v18_v9 = vld [vmem:[%s302_s1 + $0x28] sm:$0xff] }
   0x3   :  { %v171_v7 = vpack.c.bf16 %v16_v5, %v15_v2 }
   0x4   :  { %169 = vmatpush3.bf16.msra.mxu0 %v168_v4 }
   0x5   :  { %170 = vmatprep.subr.bf16.mxu0 %v219_v3 }
   0x6   :  { %7 = vsyncpa [#allocation3], 0  ;;  %v174_v10 = vpack.c.bf16 %v18_v9, %v17_v8  ;;  %v19_v11 = vld [vmem:[%s302_s1 + $0x30] sm:$0xff]  ;;  %v20_v12 = vld [vmem:[%s302_s1 + $0x38] sm:$0xff]  ;;  %s222_s15 = smov [#allocation2]   ;;  %vm99_vm1 = vcmask 654336  }
   0x7   :  { %v177_v13 = vpack.c.bf16 %v20_v12, %v19_v11  ;;  %v21_v14 = vld [vmem:[%s302_s1 + $0x40] sm:$0xff]  ;;  %v22_v15 = vld [vmem:[%s302_s1 + $0x48] sm:$0xff]  ;;  %v23_v17 = vld [vmem:[%s302_s1 + $0x50] sm:$0xff]  ;;  %s107_s16 = sshll.u32 %s222_s15, 4  ;;  %s108_s16 = int_to_ptr.vmem [resolvable:$true] %s107_s16 }
   0x8   :  { %172 = vmatpush3.bf16.msra.mxu0 %v171_v7  ;;  %v180_v16 = vpack.c.bf16 %v22_v15, %v21_v14  ;;  %v24_v18 = vld [vmem:[%s302_s1 + $0x58] sm:$0xff]  ;;  %v25_v20 = vld [vmem:[%s302_s1 + $0x60] sm:$0xff]  ;;  %v26_v21 = vld [vmem:[%s302_s1 + $0x68] sm:$0xff]  ;;  %s195_s17 = scalar_lea.vmem %s108_s16, 128  ;;  %p200_p1 = scmp.lt.s32.totalorder %s108_s16, %s108_s16 }
   0x9   :  { %173 = vmatprep.subr.bf16.mxu0 %v219_v3  ;;  %v183_v19 = vpack.c.bf16 %v24_v18, %v23_v17  ;;  %v186_v22 = vpack.c.bf16 %v26_v21, %v25_v20  ;;  %v27_v23 = vld [vmem:[%s302_s1 + $0x70] sm:$0xff]  ;;  %v28_v24 = vld [vmem:[%s302_s1 + $0x78] sm:$0xff]  ;;  %v12_v26 = vld [vmem:[%s301_s0] sm:$0xff]  ;;  %p196_p0 = scmp.ne.s32.totalorder %s108_s16, %s195_s17  ;;  %p201_p2 = scmp.lt.s32.totalorder %s195_s17, %s195_s17 }
   0xa   :  { %v189_v25 = vpack.c.bf16 %v28_v24, %v27_v23 }
   0xb   :  { %p202_p3 = por %p201_p2, %p200_p1 }
   0xc   :  { %175 = vmatpush3.bf16.msra.mxu0 %v174_v10 }
   0xd   :  { %176 = vmatprep.subr.bf16.mxu0 %v219_v3  ;;  %p203_p4 = pnand %p202_p3, %p196_p0 }
  0x10   :  { %178 = vmatpush3.bf16.msra.mxu0 %v177_v13 }
  0x11   :  { %179 = vmatprep.subr.bf16.mxu0 %v219_v3 }
  0x14   :  { %181 = vmatpush3.bf16.msra.mxu0 %v180_v16 }
  0x15   :  { %182 = vmatprep.subr.bf16.mxu0 %v219_v3 }
  0x18   :  { %184 = vmatpush3.bf16.msra.mxu0 %v183_v19 }
  0x19   :  { %185 = vmatprep.subr.bf16.mxu0 %v219_v3 }
  0x1c   :  { %187 = vmatpush3.bf16.msra.mxu0 %v186_v22 }
  0x1d   :  { %188 = vmatprep.subr.bf16.mxu0 %v219_v3 }
  0x20   :  { %190 = vmatpush3.bf16.msra.mxu0 %v189_v25 }
  0x23   :  { %165 = vmatmul.mubr.f32.vlgmr.msra.gmra.mrb[0].mxu0 %v12_v26 }
  0xf6   :  { %v95_v27 = vpop.f32.mrb[0].mxu0 }
  0xf7   :  { %100 = vst.msk [vmem:[#allocation2] sm:$0xff] %vm99_vm1, %v95_v27  ;;  %v166_v28 = vpop.f32.mrb[1].mxu0 }
  0xf8   :  { %206 = shalt.err (!%p203_p4)
}
  0xf9   :  { %s207_s19 = scalar_lea.hbm %s303_s2, 128 }
  0xfa   :  { %p208_p5 = scmp.ne.s32.totalorder %s303_s2, %s207_s19  ;;  %p211_p6 = scmp.lt.u32.totalorder %s207_s19, %s303_s2 }
  0xfc   :  { %p213_p7 = pnand %p211_p6, %p208_p5 }
  0xfe   :  { %216 = shalt.err (!%p213_p7)
}
  0xff   :  { %110 = dma.vmem_to_hbm [thread:$0]  %s108_s16, 128, %s303_s2, [#allocation3]  }
 0x100   :  { %217 = dma.done.wait [#allocation3], 128  }
 0x101   :  { %218 = vsyncadd [#allocation3], 4294967168 }
 0x102   :  { %114 = vsyncpa [#allocation3], 1 }

</bundles_post_ra>
